<compile_context>
chip_gen: v6e
topology: v6e:2x2x1
jax: 0.10.0
libtpu: 0.0.40
codegen_flags: <defaults>
</compile_context>

<pallas_src>
import functools

import jax
import jax.numpy as jnp
from jax.experimental import pallas as pl
from jax.experimental.pallas import tpu as pltpu

EPS = 1e-5


# ----------------------------------------------------------------------------
# Standalone IBN module kernel (the spec): InstanceNorm on first half channels,
# eval-mode BatchNorm on the second half, applied as a masked per-channel
# scale/shift (no lane-axis concatenate, one-pass statistics).
# ----------------------------------------------------------------------------
def _ibn_kernel(x_ref, g_ref, b_ref, o_ref, *, half):
    x = x_ref[0]                                           # (HW, C) f32
    c = x.shape[1]
    inv_n = 1.0 / x.shape[0]
    mu = jnp.sum(x, axis=0, keepdims=True) * inv_n         # per-channel mean
    ex2 = jnp.sum(x * x, axis=0, keepdims=True) * inv_n    # one-pass E[x^2]
    rstd = jax.lax.rsqrt(jnp.maximum(ex2 - mu * mu, 0.0) + EPS)
    is_in = jax.lax.broadcasted_iota(jnp.int32, (1, c), 1) < half
    g = g_ref[...]                                          # IN gamma | BN scale
    b = b_ref[...]                                          # IN beta  | BN shift
    scale = jnp.where(is_in, g * rstd, g)
    shift = jnp.where(is_in, b - mu * g * rstd, b)
    o_ref[0] = x * scale + shift


def ibn_forward(x_nchw, in_gamma, in_beta, bn_gamma, bn_beta, bn_rmean, bn_rvar):
    N, C, H, W = x_nchw.shape
    half = C // 2
    HW = H * W
    # Fold eval-mode BatchNorm into per-channel scale/shift; pack one combined
    # per-channel vector: first half = IN affine params, second half = folded BN.
    bn_scale = bn_gamma * jax.lax.rsqrt(bn_rvar + EPS)
    bn_shift = bn_beta - bn_rmean * bn_scale
    g = jnp.concatenate([in_gamma, bn_scale]).reshape(1, C).astype(jnp.float32)
    b = jnp.concatenate([in_beta, bn_shift]).reshape(1, C).astype(jnp.float32)
    x = jnp.transpose(x_nchw, (0, 2, 3, 1)).astype(jnp.float32).reshape(N, HW, C)

    kernel = functools.partial(_ibn_kernel, half=half)
    out = pl.pallas_call(
        kernel,
        out_shape=jax.ShapeDtypeStruct((N, HW, C), jnp.float32),
        grid=(N,),
        in_specs=[
            pl.BlockSpec((1, HW, C), lambda n: (n, 0, 0)),
            pl.BlockSpec((1, C), lambda n: (0, 0)),
            pl.BlockSpec((1, C), lambda n: (0, 0)),
        ],
        out_specs=pl.BlockSpec((1, HW, C), lambda n: (n, 0, 0)),
        compiler_params=pltpu.CompilerParams(dimension_semantics=("parallel",)),
    )(x, g, b)
    return jnp.transpose(out.reshape(N, H, W, C), (0, 3, 1, 2))


def ibn_reference(x_nchw, in_gamma, in_beta, bn_gamma, bn_beta, bn_rmean, bn_rvar):
    half = x_nchw.shape[1] // 2
    x1 = x_nchw[:, :half]
    mu = jnp.mean(x1, axis=(2, 3), keepdims=True)
    var = jnp.var(x1, axis=(2, 3), keepdims=True)
    o1 = (x1 - mu) * jax.lax.rsqrt(var + EPS)
    o1 = o1 * in_gamma[None, :, None, None] + in_beta[None, :, None, None]
    x2 = x_nchw[:, half:]
    sc = bn_gamma * jax.lax.rsqrt(bn_rvar + EPS)
    sh = bn_beta - bn_rmean * sc
    o2 = x2 * sc[None, :, None, None] + sh[None, :, None, None]
    return jnp.concatenate([o1, o2], axis=1)


# ----------------------------------------------------------------------------
# Fused IBN-a Bottleneck kernel (previous scope, now a single pallas_call).
# ----------------------------------------------------------------------------
@functools.lru_cache(maxsize=None)
def _roll_is_np_convention() -> bool:
    """One-time probe of pltpu.roll's rotation direction (defensive against
    convention differences across jax releases).  Not to be called under jit."""
    def k(x_ref, o_ref):
        o_ref[...] = pltpu.roll(x_ref[...], 1, axis=0)
    x = jnp.arange(8 * 128, dtype=jnp.float32).reshape(8, 128)
    y = pl.pallas_call(k, out_shape=jax.ShapeDtypeStruct((8, 128), jnp.float32))(x)
    return bool(y[1, 0] == x[0, 0])      # np.roll: row i of out == row i-1 of in


def _tap_masks(H, W):
    """(9, H*W, 1) border masks: mask[k, p] = 1 if the (dh, dw) shifted pixel for
    output position p is inside the image (3x3 conv, pad=1)."""
    p = jnp.arange(H * W, dtype=jnp.int32)
    h = p // W
    w = p - h * W
    masks = []
    for dh in (-1, 0, 1):
        for dw in (-1, 0, 1):
            valid = ((h + dh >= 0) & (h + dh < H) & (w + dw >= 0) & (w + dw < W))
            masks.append(valid.astype(jnp.float32)[:, None])
    return jnp.stack(masks, axis=0)


def _bottleneck_kernel(x_ref, mask_ref, w1_ref, g1_ref, b1_ref, w2_ref,
                       s2_ref, h2_ref, w3_ref, s3_ref, h3_ref, o_ref,
                       *, half, shifts):
    x = x_ref[0]                                           # (HW, Cin) f32
    hw = x.shape[0]
    cw = w1_ref.shape[1]

    # ---- stage 1: 1x1 conv (bf16 MXU, f32 acc) + IBN + ReLU -----------------
    y = jnp.dot(x.astype(jnp.bfloat16), w1_ref[...],
                preferred_element_type=jnp.float32)         # (HW, Cw)
    inv_n = 1.0 / hw
    mu = jnp.sum(y, axis=0, keepdims=True) * inv_n
    ex2 = jnp.sum(y * y, axis=0, keepdims=True) * inv_n     # one-pass stats
    rstd = jax.lax.rsqrt(jnp.maximum(ex2 - mu * mu, 0.0) + EPS)
    is_in = jax.lax.broadcasted_iota(jnp.int32, (1, cw), 1) < half
    g = g1_ref[...]
    b = b1_ref[...]
    scale = jnp.where(is_in, g * rstd, g)                   # IN half | folded-BN half
    shift = jnp.where(is_in, b - mu * g * rstd, b)
    a1 = jnp.maximum(y * scale + shift, 0.0)                # (HW, Cw) f32

    # ---- stage 2: 3x3 conv (pad=1) as 9 sublane rolls + border masks --------
    # No jnp.pad, no unaligned slice+reshape: the flattened (HW, Cw) activation
    # is rotated along the row (sublane) axis per tap and wrapped rows are
    # zeroed with precomputed masks, then fed to the MXU.
    acc = jnp.zeros((hw, cw), jnp.float32)
    for k in range(9):
        sh = shifts[k]
        patch = a1 if sh == 0 else pltpu.roll(a1, sh, axis=0)
        patch = patch * mask_ref[k]
        acc = acc + jnp.dot(patch.astype(jnp.bfloat16), w2_ref[k],
                            preferred_element_type=jnp.float32)
    a2 = jnp.maximum(acc * s2_ref[...] + h2_ref[...], 0.0)  # (HW, Cw) f32

    # ---- stage 3: 1x1 conv + BN + residual add + ReLU -----------------------
    y3 = jnp.dot(a2.astype(jnp.bfloat16), w3_ref[...],
                 preferred_element_type=jnp.float32)        # (HW, Cout)
    o_ref[0] = jnp.maximum(y3 * s3_ref[...] + h3_ref[...] + x, 0.0)


def bottleneck_forward(x_nchw, p):
    N, Cin, H, W = x_nchw.shape
    HW = H * W
    Cw = p["w1"].shape[1]
    Cout = p["w3"].shape[1]

    # Lane-dense, pre-flattened activation layout (channels on the 128-lane axis).
    x = jnp.transpose(x_nchw, (0, 2, 3, 1)).astype(jnp.float32).reshape(N, HW, Cin)
    masks = _tap_masks(H, W)
    w2 = p["w2"].reshape(9, Cw, Cw)

    np_roll = _roll_is_np_convention()
    shifts = []
    for dh in (-1, 0, 1):
        for dw in (-1, 0, 1):
            off = dh * W + dw
            shifts.append(((-off) % HW) if np_roll else (off % HW))
    kernel = functools.partial(_bottleneck_kernel, half=p["half"],
                               shifts=tuple(shifts))

    flops = 2 * N * HW * (Cin * Cw + 9 * Cw * Cw + Cw * Cout)
    bytes_accessed = (4 * N * HW * (Cin + Cout)
                      + 2 * (Cin * Cw + 9 * Cw * Cw + Cw * Cout)
                      + 4 * 9 * HW + 4 * (4 * Cw + 2 * Cout))
    cost = pl.CostEstimate(flops=flops, transcendentals=N * Cw,
                           bytes_accessed=bytes_accessed)

    out = pl.pallas_call(
        kernel,
        out_shape=jax.ShapeDtypeStruct((N, HW, Cout), jnp.float32),
        grid=(N,),
        in_specs=[
            pl.BlockSpec((1, HW, Cin), lambda n: (n, 0, 0)),
            pl.BlockSpec((9, HW, 1), lambda n: (0, 0, 0)),
            pl.BlockSpec((Cin, Cw), lambda n: (0, 0)),
            pl.BlockSpec((1, Cw), lambda n: (0, 0)),
            pl.BlockSpec((1, Cw), lambda n: (0, 0)),
            pl.BlockSpec((9, Cw, Cw), lambda n: (0, 0, 0)),
            pl.BlockSpec((1, Cw), lambda n: (0, 0)),
            pl.BlockSpec((1, Cw), lambda n: (0, 0)),
            pl.BlockSpec((Cw, Cout), lambda n: (0, 0)),
            pl.BlockSpec((1, Cout), lambda n: (0, 0)),
            pl.BlockSpec((1, Cout), lambda n: (0, 0)),
        ],
        out_specs=pl.BlockSpec((1, HW, Cout), lambda n: (n, 0, 0)),
        compiler_params=pltpu.CompilerParams(
            dimension_semantics=("parallel",),
            vmem_limit_bytes=32 * 1024 * 1024,
        ),
        cost_estimate=cost,
    )(x, masks, p["w1"], p["g1"], p["b1"], w2, p["s2"], p["h2"],
      p["w3"], p["s3"], p["h3"])
    return jnp.transpose(out.reshape(N, H, W, Cout), (0, 3, 1, 2))


# ----------------------------------------------------------------------------
# Parameter construction + pure-JAX references for the correctness check.
# ----------------------------------------------------------------------------
def make_params(key, inplanes, planes):
    width = planes                 # base_width=64, groups=1 -> width = planes
    cout = planes * 4              # expansion = 4
    half = width // 2
    ks = jax.random.split(key, 8)

    def bn_fold(k, c):
        k1, k2, k3, k4 = jax.random.split(k, 4)
        gamma = 1.0 + 0.1 * jax.random.normal(k1, (c,), jnp.float32)
        beta = 0.1 * jax.random.normal(k2, (c,), jnp.float32)
        rmean = 0.1 * jax.random.normal(k3, (c,), jnp.float32)
        rvar = jnp.abs(jax.random.normal(k4, (c,), jnp.float32)) + 0.5
        scale = gamma * jax.lax.rsqrt(rvar + EPS)
        shift = beta - rmean * scale
        return scale, shift

    p = {"half": half}
    # Weights in bf16 at the kernel boundary (MXU path); f32 accumulation in-kernel.
    p["w1"] = (0.1 * jax.random.normal(ks[0], (inplanes, width), jnp.float32)
               ).astype(jnp.bfloat16)
    in_gamma = 1.0 + 0.1 * jax.random.normal(ks[1], (half,), jnp.float32)
    in_beta = 0.1 * jax.random.normal(ks[2], (half,), jnp.float32)
    bn1_scale, bn1_shift = bn_fold(ks[3], width - half)
    # Combined per-channel vectors: IN affine on the first half, folded BN on the rest.
    p["g1"] = jnp.concatenate([in_gamma, bn1_scale]).reshape(1, width)
    p["b1"] = jnp.concatenate([in_beta, bn1_shift]).reshape(1, width)
    p["w2"] = (0.1 * jax.random.normal(ks[4], (3, 3, width, width), jnp.float32)
               ).astype(jnp.bfloat16)                         # HWIO
    s2, h2 = bn_fold(ks[5], width)
    p["s2"], p["h2"] = s2.reshape(1, width), h2.reshape(1, width)
    p["w3"] = (0.1 * jax.random.normal(ks[6], (width, cout), jnp.float32)
               ).astype(jnp.bfloat16)
    s3, h3 = bn_fold(ks[7], cout)
    p["s3"], p["h3"] = s3.reshape(1, cout), h3.reshape(1, cout)
    return p


def bottleneck_reference(x_nchw, p):
    x = jnp.transpose(x_nchw, (0, 2, 3, 1)).astype(jnp.float32)
    half = p["half"]
    g1, b1 = p["g1"][0], p["b1"][0]
    y = jnp.einsum("nhwc,cd->nhwd", x.astype(jnp.bfloat16), p["w1"],
                   preferred_element_type=jnp.float32)
    y1 = y[..., :half]
    mu = jnp.mean(y1, axis=(1, 2), keepdims=True)
    var = jnp.var(y1, axis=(1, 2), keepdims=True)
    o1 = (y1 - mu) * jax.lax.rsqrt(var + EPS) * g1[:half] + b1[:half]
    o2 = y[..., half:] * g1[half:] + b1[half:]
    a1 = jax.nn.relu(jnp.concatenate([o1, o2], axis=-1))
    a2 = jax.lax.conv_general_dilated(
        a1.astype(jnp.bfloat16), p["w2"], window_strides=(1, 1),
        padding=((1, 1), (1, 1)), dimension_numbers=("NHWC", "HWIO", "NHWC"),
        preferred_element_type=jnp.float32)
    a2 = jax.nn.relu(a2 * p["s2"][0] + p["h2"][0])
    y3 = jnp.einsum("nhwc,cd->nhwd", a2.astype(jnp.bfloat16), p["w3"],
                    preferred_element_type=jnp.float32)
    y3 = y3 * p["s3"][0] + p["h3"][0]
    return jnp.transpose(jax.nn.relu(y3 + x), (0, 3, 1, 2))


if __name__ == "__main__":
    key = jax.random.PRNGKey(0)
    ks = jax.random.split(key, 9)

    # ---- 1) the IBN module itself (the spec) --------------------------------
    N, C, H, W = 2, 256, 16, 16
    half = C // 2
    x = jax.random.normal(ks[0], (N, C, H, W), jnp.float32)
    in_gamma = 1.0 + 0.1 * jax.random.normal(ks[1], (half,), jnp.float32)
    in_beta = 0.1 * jax.random.normal(ks[2], (half,), jnp.float32)
    bn_gamma = 1.0 + 0.1 * jax.random.normal(ks[3], (C - half,), jnp.float32)
    bn_beta = 0.1 * jax.random.normal(ks[4], (C - half,), jnp.float32)
    bn_rmean = 0.1 * jax.random.normal(ks[5], (C - half,), jnp.float32)
    bn_rvar = jnp.abs(jax.random.normal(ks[6], (C - half,), jnp.float32)) + 0.5

    out_ibn = jax.block_until_ready(
        ibn_forward(x, in_gamma, in_beta, bn_gamma, bn_beta, bn_rmean, bn_rvar))
    ref_ibn = jax.block_until_ready(
        ibn_reference(x, in_gamma, in_beta, bn_gamma, bn_beta, bn_rmean, bn_rvar))
    assert out_ibn.shape == x.shape
    assert float(jnp.max(jnp.abs(out_ibn - ref_ibn))) < 1e-3, "IBN mismatch"

    # ---- 2) fused IBN-a Bottleneck (previous scope + perf feedback) ---------
    N2, inplanes, planes, H2, W2 = 2, 128, 32, 16, 16
    x2 = jax.random.normal(ks[7], (N2, inplanes, H2, W2), jnp.float32)
    params = make_params(ks[8], inplanes, planes)

    out_bn = jax.block_until_ready(bottleneck_forward(x2, params))
    ref_bn = jax.block_until_ready(bottleneck_reference(x2, params))
    assert out_bn.shape == (N2, planes * 4, H2, W2)
    assert float(jnp.max(jnp.abs(out_bn - ref_bn))) < 1e-2, "Bottleneck mismatch"

    print("KERNEL_OK")
</pallas_src>

<mosaic_0001>
module attributes {stable_mosaic.version = 11 : i64} {
  func.func @_ibn_kernel(%arg0: i32, %arg1: memref<1x256x256xf32, #tpu.memory_space<vmem>>, %arg2: memref<1x256xf32, #tpu.memory_space<vmem>>, %arg3: memref<1x256xf32, #tpu.memory_space<vmem>>, %arg4: memref<1x256x256xf32, #tpu.memory_space<vmem>>) attributes {dimension_semantics = [#tpu.dimension_semantics<parallel>], iteration_bounds = array<i64: 2>, scalar_prefetch = 0 : i64, scratch_operands = 0 : i64, tpu.core_type = #tpu.core_type<tc>, window_params = [{transform_indices = @transform_0, window_bounds = array<i64: 1, 256, 256>}, {pipeline_mode = #tpu.pipeline_mode<synchronous>, transform_indices = @transform_1, window_bounds = array<i64: 1, 256>}, {pipeline_mode = #tpu.pipeline_mode<synchronous>, transform_indices = @transform_2, window_bounds = array<i64: 1, 256>}, {transform_indices = @transform_3, window_bounds = array<i64: 1, 256, 256>}]} {
    %c0 = arith.constant 0 : index
    %c0_0 = arith.constant 0 : index
    %c0_1 = arith.constant 0 : index
    %0 = vector.load %arg1[%c0, %c0_0, %c0_1] : memref<1x256x256xf32, #tpu.memory_space<vmem>>, vector<1x256x256xf32>
    %1 = vector.shape_cast %0 : vector<1x256x256xf32> to vector<256x256xf32>
    %cst = arith.constant dense<0.000000e+00> : vector<256xf32>
    %2 = vector.multi_reduction <add>, %1, %cst [0] : vector<256x256xf32> to vector<256xf32>
    %3 = vector.shape_cast %2 : vector<256xf32> to vector<1x256xf32>
    %cst_2 = arith.constant 3.906250e-03 : f32
    %4 = vector.broadcast %cst_2 : f32 to vector<1x256xf32>
    %5 = arith.mulf %3, %4 : vector<1x256xf32>
    %6 = arith.mulf %1, %1 : vector<256x256xf32>
    %cst_3 = arith.constant dense<0.000000e+00> : vector<256xf32>
    %7 = vector.multi_reduction <add>, %6, %cst_3 [0] : vector<256x256xf32> to vector<256xf32>
    %8 = vector.shape_cast %7 : vector<256xf32> to vector<1x256xf32>
    %cst_4 = arith.constant 3.906250e-03 : f32
    %9 = vector.broadcast %cst_4 : f32 to vector<1x256xf32>
    %10 = arith.mulf %8, %9 : vector<1x256xf32>
    %11 = arith.mulf %5, %5 : vector<1x256xf32>
    %12 = arith.subf %10, %11 : vector<1x256xf32>
    %cst_5 = arith.constant 0.000000e+00 : f32
    %13 = vector.broadcast %cst_5 : f32 to vector<1x256xf32>
    %14 = arith.maximumf %12, %13 : vector<1x256xf32>
    %cst_6 = arith.constant 9.99999974E-6 : f32
    %15 = vector.broadcast %cst_6 : f32 to vector<1x256xf32>
    %16 = arith.addf %14, %15 : vector<1x256xf32>
    %17 = math.rsqrt %16 : vector<1x256xf32>
    %18 = tpu.iota {dimensions = array<i32: 1>} : vector<1x256xi32>
    %c128_i32 = arith.constant 128 : i32
    %19 = vector.broadcast %c128_i32 : i32 to vector<1x256xi32>
    %20 = arith.cmpi slt, %18, %19 : vector<1x256xi32>
    %c0_7 = arith.constant 0 : index
    %c0_8 = arith.constant 0 : index
    %21 = vector.load %arg2[%c0_7, %c0_8] : memref<1x256xf32, #tpu.memory_space<vmem>>, vector<1x256xf32>
    %c0_9 = arith.constant 0 : index
    %c0_10 = arith.constant 0 : index
    %22 = vector.load %arg3[%c0_9, %c0_10] : memref<1x256xf32, #tpu.memory_space<vmem>>, vector<1x256xf32>
    %23 = arith.mulf %21, %17 : vector<1x256xf32>
    %24 = arith.select %20, %23, %21 : vector<1x256xi1>, vector<1x256xf32>
    %25 = arith.mulf %5, %21 : vector<1x256xf32>
    %26 = arith.mulf %25, %17 : vector<1x256xf32>
    %27 = arith.subf %22, %26 : vector<1x256xf32>
    %28 = arith.select %20, %27, %22 : vector<1x256xi1>, vector<1x256xf32>
    %29 = vector.broadcast %24 : vector<1x256xf32> to vector<256x256xf32>
    %30 = arith.mulf %1, %29 : vector<256x256xf32>
    %31 = vector.broadcast %28 : vector<1x256xf32> to vector<256x256xf32>
    %32 = arith.addf %30, %31 : vector<256x256xf32>
    %c0_11 = arith.constant 0 : index
    %c0_12 = arith.constant 0 : index
    %c0_13 = arith.constant 0 : index
    %33 = vector.load %arg4[%c0_11, %c0_12, %c0_13] : memref<1x256x256xf32, #tpu.memory_space<vmem>>, vector<1x256x256xf32>
    %34 = vector.shape_cast %33 : vector<1x256x256xf32> to vector<256x256xf32>
    %35 = vector.shape_cast %32 : vector<256x256xf32> to vector<1x256x256xf32>
    tpu.vector_store %arg4[%c0_11, %c0_12, %c0_13], %35 {strides = array<i32>} : memref<1x256x256xf32, #tpu.memory_space<vmem>>, vector<1x256x256xf32>,
    return
  }
  func.func @transform_0(%arg0: i32) -> (i32, i32, i32) {
    %c0_i32 = arith.constant 0 : i32
    %c0_i32_0 = arith.constant 0 : i32
    %c0_i32_1 = arith.constant 0 : i32
    return %arg0, %c0_i32, %c0_i32_0 : i32, i32, i32
  }
  func.func @transform_1(%arg0: i32) -> (i32, i32) {
    %c0_i32 = arith.constant 0 : i32
    %c0_i32_0 = arith.constant 0 : i32
    %c0_i32_1 = arith.constant 0 : i32
    return %c0_i32, %c0_i32_0 : i32, i32
  }
  func.func @transform_2(%arg0: i32) -> (i32, i32) {
    %c0_i32 = arith.constant 0 : i32
    %c0_i32_0 = arith.constant 0 : i32
    %c0_i32_1 = arith.constant 0 : i32
    return %c0_i32, %c0_i32_0 : i32, i32
  }
  func.func @transform_3(%arg0: i32) -> (i32, i32, i32) {
    %c0_i32 = arith.constant 0 : i32
    %c0_i32_0 = arith.constant 0 : i32
    %c0_i32_1 = arith.constant 0 : i32
    return %arg0, %c0_i32, %c0_i32_0 : i32, i32, i32
  }
}

</mosaic_0001>

<bundles_post_ra>
// kernel: tpu_custom_call.1
= control target key start
LH: loop header
LB: loop body
LE: loop exit
PB: predicated region body
PF: predicated region fallthrough
CT: control target
= control target key end

     0   :  { %8 = vsyncpa [#allocation3], 0  ;;  %s2134_s0 = inlined_call_operand.hbm [shape: f32[2,256,256], index: 0, kind: input, shape index: {}]   ;;  %s2135_s1 = inlined_call_operand.hbm [shape: f32[1,256], index: 1, kind: input, shape index: {}]   ;;  %s2136_s2 = inlined_call_operand.vmem [shape: f32[1,256], index: 2, kind: input, shape index: {}]   ;;  %s2137_s3 = inlined_call_operand.hbm [shape: f32[2,256,256], index: 3, kind: output, shape index: {}]  }
   0x1   :  { %10 = vsyncpa [#allocation3 + $0x1], 0 }
   0x2   :  { %11 = vsyncpa [#allocation6], 0 }
   0x3   :  { %12 = vsyncpa [#allocation4], 0 }
   0x4   :  { %14 = vsyncpa [#allocation4 + $0x1], 0  ;;  %s1130_s12 = smov 0   ;;  %s1132_s13 = smov 0  }
   0x5   :  { %s1134_s14 = smov 0   ;;  %s1136_s15 = smov 0  }
   0x6 LB: > { %s1151_s16 = sadd.s32 4294967295, %s1100_s15   ;;  %s894_s17 = sadd.s32 4294967294, %s1100_s15   ;;  %s1100_s15 = sphi %s1136_s15, %s2252_s15   ;;  %s1096_s14 = sphi %s1134_s14, %s2251_s14   ;;  %s1092_s13 = sphi %s1132_s13, %s2250_s13   ;;  %s1088_s12 = sphi %s1130_s12, %s2249_s12  }
   0x7   : > { %s1155_s18 = sadd.s32 1, %s1100_s15   ;;  %s27_s19 = sadd.s32 1, %s1096_s14 }
   0x8   : > { %s24_s20 = ssub.s32 %s1100_s15, %s1155_s18  ;;  %p34_p0 = scmp.ne.s32.totalorder %s1096_s14, %s1092_s13 }
   0x9   : > { %p25_p1 = scmp.eq.s32.totalorder %s24_s20, 0  ;;  %p35_p2 = scmp.eq.s32.totalorder %s1100_s15, 0 }
   0xa   : > { %p40_p3 = scmp.ne.s32.totalorder %s1092_s13, %s1088_s12  ;;  %p2138_p4 = scmp.eq.s32.totalorder %s1151_s16, 0 }
   0xb   : > { %s1167_s21 = scalar_select %p25_p1, %s1096_s14, %s27_s19  }
   0xc   : > { %p1169_p5 = por %p35_p2, %p34_p0  ;;  %p1175_p6 = por %p2138_p4, %p40_p3 }
   0xd   : > { %p106_p7 = scmp.eq.s32.totalorder %s1151_s16, 1  ;;  %p112_p8 = scmp.eq.s32.totalorder %s894_s17, 1 }
   0xe   : > { %s2159_s23 = scalar_select %p1175_p6, 1, 0 }
   0xf   : > { %p895_p9 = scmp.ge.s32.totalorder %s1100_s15, 1  ;;  %p119_p10 = scmp.lt.s32.totalorder %s1100_s15, 3 }
  0x10   : > { %p1182_p11 = por %p106_p7, %p34_p0  ;;  %p1186_p12 = por %p112_p8, %p40_p3 }
  0x11   : > { %p1190_p13 = pnand %p895_p9, %p119_p10  ;;  %s1102_s27 = smov [#allocation5]  }
  0x12   : > { %s2160_s24 = scalar_select %p1182_p11, 1, 0 }
  0x13   : > { %s2161_s25 = scalar_select %p1186_p12, 1, 0 }
  0x14   : > { %s2162_s26 = scalar_select %p1190_p13, 1, 0 }
  0x15   : > { %p920_p2 = pneg %p1190_p13  ;;  %s132_s28 = sshll.u32 %s1102_s27, 4  ;;  %s133_s28 = int_to_ptr.vmem [resolvable:$true] %s132_s28 }
  0x16   : > { %p933_p4 = scmp.lt.s32.totalorder %s1100_s15, 2  ;;  %p2163_p0 = scmp.eq.s32.totalorder %s1151_s16, 0 }
  0x17   : > { %s146_s30 = sand.u32 1, %s1096_s14   ;;  %s989_s6 = scalar_lea.vmem %s133_s28, 32 }
  0x18   : > { %p1200_p7 = pnand %p920_p2, %p2163_p0  ;;  %p1207_p3 = pnand %p933_p4, %p1169_p5 }
  0x19   : > { %s898_s5 = sshll.u32 %s146_s30, 9  ;;  %p990_p9 = scmp.ne.s32.totalorder %s133_s28, %s989_s6 }
  0x1a   : > { %p980_p8 = pneg %p1200_p7  ;;  %p997_p12 = scmp.lt.s32.totalorder %s133_s28, %s133_s28 }
  0x1b   : > { %p998_p11 = scmp.lt.s32.totalorder %s989_s6, %s989_s6 }
  0x1c   : > { %p992_p10 = pnand %p990_p9, %p980_p8 }
  0x1d   : > { %p999_p2 = por %p998_p11, %p997_p12 }
  0x1e   : > { %p993_p1 = pneg %p992_p10 }
  0x20   : > { %p1000_p0 = pnand %p999_p2, %p993_p1 }
  0x22   : > { %1003 = shalt.err (!%p1000_p0)
}
  0x23   : > { %923 = dma.hbm_to_vmem [thread:$0]  (!%p1200_p7), %s2135_s1, 32, %s133_s28, [#allocation6]  }
  0x24   : > { %s910_s9 = sshll.u32 %s1100_s15, 13  ;;  %s150_s10 = scalar_lea.vmem [#allocation2], %s898_s5 }
  0x25   : > { %s157_s11 = sshll.u32 %s150_s10, 4  ;;  %s1222_s20 = scalar_lea.hbm %s2134_s0, %s910_s9  ;;  %s1224_s11 = int_to_ptr.vmem [resolvable:$true] %s157_s11 }
  0x26   : > { %s1226_s22 = scalar_lea.sflag [#allocation3], %s146_s30  ;;  %s1004_s27 = scalar_lea.hbm %s1222_s20, 8192 }
  0x27   : > { %p1005_p4 = scmp.ne.s32.totalorder %s1222_s20, %s1004_s27  ;;  %p1006_p5 = pneg %p1207_p3 }
  0x28   : > { %s1009_s5 = scalar_lea.hbm %s2134_s0, 16384  ;;  %p1010_p1 = scmp.lt.s32.totalorder %s1222_s20, %s2134_s0 }
  0x29   : > { %p1007_p11 = pnand %p1006_p5, %p1005_p4  ;;  %p1011_p7 = scmp.lt.s32.totalorder %s1009_s5, %s1004_s27 }
  0x2b   : > { %p1008_p12 = pneg %p1007_p11  ;;  %p1012_p8 = por %p1011_p7, %p1010_p1 }
  0x2d   : > { %p1013_p9 = pnand %p1012_p8, %p1008_p12 }
  0x2f   : > { %1016 = shalt.err (!%p1013_p9)
}
  0x30   : > { %s1017_s30 = scalar_lea.vmem %s1224_s11, 8192  ;;  %s1103_s8 = smov [#allocation2]  }
  0x31   : > { %p1018_p10 = scmp.ne.s32.totalorder %s1224_s11, %s1017_s30  ;;  %s1022_s9 = sshll.u32 %s1103_s8, 4  ;;  %s1023_s9 = int_to_ptr.vmem [resolvable:$false] %s1022_s9 }
  0x32   : > { %s1024_s10 = scalar_lea.vmem %s1023_s9, 16384  ;;  %p1025_p4 = scmp.lt.s32.totalorder %s1224_s11, %s1023_s9 }
  0x33   : > { %p1020_p2 = pnand %p1018_p10, %p1006_p5  ;;  %p1026_p11 = scmp.lt.s32.totalorder %s1024_s10, %s1017_s30 }
  0x35   : > { %p1021_p0 = pneg %p1020_p2  ;;  %p1027_p6 = por %p1026_p11, %p1025_p4 }
  0x37   : > { %p1028_p13 = pnand %p1027_p6, %p1021_p0 }
  0x39   : > { %1031 = shalt.err (!%p1028_p13)
}
  0x3a   : > { %s1104_s17 = smov 256   ;;  %s1105_s19 = smov 16  }
  0x3b   : > { %927 = dma.hbm_to_vmem [thread:$0]  (!%p1207_p3), %s1222_s20, 8192, %s1224_s11, %s1226_s22, %s1104_s17, %s1104_s17, %s1105_s19  }
  0x3c   : > { %p2166_p5 = scmp.ne.s32.totalorder %s2162_s26, 0 }
  0x3e   : > { %169 = sbr.rel (%p2166_p5) target bundleno = 244 (0xf4), region = 32 }
  0x43   : > { %s1250_s27 = sand.u32 1, %s1092_s13   ;;  %p2167_p6 = scmp.ne.s32.totalorder %s2159_s23, 0 }
  0x44   : > { %s902_s28 = sshll.u32 %s1250_s27, 9  ;;  %s172_s29 = scalar_lea.sflag [#allocation3], %s1250_s27 }
  0x45   : > { %s1256_s5 = scalar_lea.vmem [#allocation2], %s902_s28 }
  0x46   : > { %1075 = dma.done.wait (%p2167_p6), %s172_s29, 8192  }
  0x47   : > { %1077 = vsyncadd (%p2167_p6), %s172_s29, 4294959104  ;;  %p2168_p13 = scmp.eq.s32.totalorder %s1151_s16, 0 }
  0x49   : > { %1079 = dma.done.wait (%p2168_p13), [#allocation6], 32   ;;  %p2169_p3 = pmov %p2168_p13 }
  0x4a   : > { %v1267_v0 = vld [vmem:[%s1256_s5] sm:$0xff]  ;;  %v1270_v1 = vld [vmem:[%s1256_s5 + $0x8] sm:$0xff]  ;;  %v1273_v2 = vld [vmem:[%s1256_s5 + $0x10] sm:$0xff]  ;;  %v505_v3 = vlaneseq  ;;  %s1661_s4 = scalar_lea.vmem [#allocation7], %s902_s28  ;;  %s911_s11 = sshll.u32 %s1151_s16, 13 }
  0x4b   : > { %1081 = vsyncadd (%p2169_p3), [#allocation6], 4294967264  ;;  %2170 = vst [vmem:[#allocation11_spill] sm:$0xff] %v1267_v0  ;;  %v1276_v4 = vld [vmem:[%s1256_s5 + $0x18] sm:$0xff]  ;;  %v1279_v5 = vld [vmem:[%s1256_s5 + $0x20] sm:$0xff]  ;;  %v266_v7 = vadd.f32 %v1273_v2, %v1267_v0  ;;  %v1327_v27 = vmul.f32 %v1267_v0, %v1267_v0  ;;  %v1331_v28 = vmul.f32 %v1270_v1, %v1270_v1  ;;  %v1335_v29 = vmul.f32 %v1273_v2, %v1273_v2  ;;  %s811_s20 = sshll.u32 %s1661_s4, 4  ;;  %s2080_s6 = scalar_lea.hbm %s2137_s3, %s911_s11  ;;  %s2082_s20 = int_to_ptr.vmem [resolvable:$true] %s811_s20 }
  0x4c   : > { %2171 = vst [vmem:[#allocation12_spill] sm:$0xff] %v1273_v2  ;;  %2172 = vst [vmem:[#allocation13_spill] sm:$0xff] %v1279_v5  ;;  %v1282_v6 = vld [vmem:[%s1256_s5 + $0x28] sm:$0xff]  ;;  %v1287_v8 = vld [vmem:[%s1256_s5 + $0x30] sm:$0xff]  ;;  %v303_v9 = vadd.f32 %v1276_v4, %v1270_v1  ;;  %v1299_v14 = vshrl.u32 %v505_v3, 7  ;;  %v1343_v32 = vmul.f32 %v1276_v4, %v1276_v4  ;;  %v1347_v33 = vmul.f32 %v1279_v5, %v1279_v5  ;;  %s798_s7 = scalar_lea.sflag [#allocation4], %s1250_s27 }
  0x4d   : > { %2173 = vst [vmem:[#allocation14_spill] sm:$0xff] %v1287_v8  ;;  %v1292_v10 = vld [vmem:[%s1256_s5 + $0x38] sm:$0xff]  ;;  %v267_v11 = vadd.f32 %v266_v7, %v1279_v5  ;;  %v1296_v12 = vld [vmem:[%s1256_s5 + $0x40] sm:$0xff]  ;;  %v1302_v15 = vld [vmem:[%s1256_s5 + $0x48] sm:$0xff]  ;;  %v1351_v34 = vmul.f32 %v1282_v6, %v1282_v6  ;;  %v1365_v39 = vmul.f32 %v1287_v8, %v1287_v8  ;;  %s1032_s30 = scalar_lea.vmem %s2082_s20, 8192  ;;  %p2246_p1 = scmp.ne.s32.totalorder %s2160_s24, 0 }
  0x4e   : > { %2174 = vst [vmem:[#allocation15_spill] sm:$0xff] %v1296_v12  ;;  %v304_v13 = vadd.f32 %v303_v9, %v1282_v6  ;;  %2175 = vst [vmem:[#allocation16_spill] sm:$0xff] %v1299_v14  ;;  %v1306_v17 = vld [vmem:[%s1256_s5 + $0x50] sm:$0xff]  ;;  %v1310_v19 = vld [vmem:[%s1256_s5 + $0x58] sm:$0xff]  ;;  %v1318_v23 = vsub.s32 0, %v1299_v14  ;;  %v1369_v40 = vmul.f32 %v1292_v10, %v1292_v10  ;;  %v1373_v41 = vmul.f32 %v1296_v12, %v1296_v12  ;;  %p1033_p12 = scmp.ne.s32.totalorder %s2082_s20, %s1032_s30  ;;  %s1107_s8 = smov [#allocation7]  }
  0x4f   : > { %v268_v16 = vadd.f32 %v267_v11, %v1287_v8  ;;  %2176 = vst [vmem:[#allocation17_spill] sm:$0xff] %v1306_v17  ;;  %v1314_v21 = vld [vmem:[%s1256_s5 + $0x60] sm:$0xff]  ;;  %v1322_v25 = vld [vmem:[%s1256_s5 + $0x68] sm:$0xff]  ;;  %v1338_v30 = vld [vmem:[%s1256_s5 + $0x70] sm:$0xff]  ;;  %v1387_v46 = vmul.f32 %v1302_v15, %v1302_v15  ;;  %v1391_v47 = vmul.f32 %v1306_v17, %v1306_v17  ;;  %v1395_v48 = vmul.f32 %v1310_v19, %v1310_v19  ;;  %s1036_s9 = sshll.u32 %s1107_s8, 4  ;;  %s1037_s9 = int_to_ptr.vmem [resolvable:$false] %s1036_s9 }
  0x50   : > { %v305_v18 = vadd.f32 %v304_v13, %v1292_v10  ;;  %2177 = vst [vmem:[#allocation18_spill] sm:$0xff] %v1314_v21  ;;  %2178 = vst [vmem:[#allocation19_spill] sm:$0xff] %v1338_v30  ;;  %v1354_v35 = vld [vmem:[%s1256_s5 + $0x78] sm:$0xff]  ;;  %v1357_v36 = vld [vmem:[%s1256_s5 + $0x80] sm:$0xff]  ;;  %v1409_v53 = vmul.f32 %v1314_v21, %v1314_v21  ;;  %v1413_v54 = vmul.f32 %v1322_v25, %v1322_v25  ;;  %p1034_p7 = pnand %p1033_p12, %p2246_p1  ;;  %s1038_s10 = scalar_lea.vmem %s1037_s9, 16384 }
  0x51   : > { %v269_v20 = vadd.f32 %v268_v16, %v1296_v12  ;;  %2179 = vst [vmem:[#allocation20_spill] sm:$0xff] %v1357_v36  ;;  %v1360_v37 = vld [vmem:[%s1256_s5 + $0x88] sm:$0xff]  ;;  %v1376_v42 = vld [vmem:[%s1256_s5 + $0x90] sm:$0xff]  ;;  %v1379_v43 = vld [vmem:[%s1256_s5 + $0x98] sm:$0xff]  ;;  %v1417_v55 = vmul.f32 %v1338_v30, %v1338_v30  ;;  %v1431_v60 = vmul.f32 %v1354_v35, %v1354_v35  ;;  %v1435_v61 = vmul.f32 %v1357_v36, %v1357_v36  ;;  %p1039_p9 = scmp.lt.s32.totalorder %s2082_s20, %s1037_s9  ;;  %p1040_p10 = scmp.lt.s32.totalorder %s1038_s10, %s1032_s30 }
  0x52   : > { %v306_v22 = vadd.f32 %v305_v18, %v1302_v15  ;;  %2180 = vst [vmem:[#allocation21_spill] sm:$0xff] %v1376_v42  ;;  %v1382_v44 = vld [vmem:[%s1256_s5 + $0xa0] sm:$0xff]  ;;  %v1398_v49 = vld [vmem:[%s1256_s5 + $0xa8] sm:$0xff]  ;;  %v1401_v50 = vld [vmem:[%s1256_s5 + $0xb0] sm:$0xff]  ;;  %v1439_v62 = vmul.f32 %v1360_v37, %v1360_v37  ;;  %v1453_v11 = vmul.f32 %v1376_v42, %v1376_v42  ;;  %v1457_v13 = vmul.f32 %v1379_v43, %v1379_v43  ;;  %p1035_p8 = pneg %p1034_p7 }
  0x53   : > { %v270_v26 = vadd.f32 %v269_v20, %v1306_v17  ;;  %2181 = vst [vmem:[#allocation22_spill] sm:$0xff] %v1382_v44  ;;  %2182 = vst [vmem:[#allocation23_spill] sm:$0xff] %v1401_v50  ;;  %v1404_v51 = vld [vmem:[%s1256_s5 + $0xb8] sm:$0xff]  ;;  %v1420_v56 = vld [vmem:[%s1256_s5 + $0xc0] sm:$0xff]  ;;  %v1461_v16 = vmul.f32 %v1382_v44, %v1382_v44  ;;  %p1041_p2 = por %p1040_p10, %p1039_p9 }
  0x54   : > { %v307_v31 = vadd.f32 %v306_v22, %v1310_v19  ;;  %2183 = vst [vmem:[#allocation24_spill] sm:$0xff] %v1420_v56  ;;  %v1423_v57 = vld [vmem:[%s1256_s5 + $0xc8] sm:$0xff]  ;;  %v1426_v58 = vld [vmem:[%s1256_s5 + $0xd0] sm:$0xff]  ;;  %v1442_v63 = vld [vmem:[%s1256_s5 + $0xd8] sm:$0xff] }
  0x55   : > { %v271_v38 = vadd.f32 %v270_v26, %v1314_v21  ;;  %2184 = vst [vmem:[#allocation25_spill] sm:$0xff] %v1426_v58  ;;  %v1445_v3 = vld [vmem:[%s1256_s5 + $0xe0] sm:$0xff]  ;;  %v1448_v7 = vld [vmem:[%s1256_s5 + $0xe8] sm:$0xff]  ;;  %2185 = vst [vmem:[#allocation26_spill] sm:$0xff] %v1461_v16  ;;  %v1501_v21 = vmul.f32 %v1423_v57, %v1423_v57  ;;  %v1505_v17 = vmul.f32 %v1426_v58, %v1426_v58  ;;  %p1042_p0 = pnand %p1041_p2, %p1035_p8 }
  0x56   : > { %v308_v45 = vadd.f32 %v307_v31, %v1322_v25  ;;  %v1464_v18 = vld [vmem:[%s1256_s5 + $0xf0] sm:$0xff]  ;;  %v1467_v20 = vld [vmem:[%s1256_s5 + $0xf8] sm:$0xff]  ;;  %v1470_v22 = vld [vmem:[%s1256_s5 + $0x100] sm:$0xff]  ;;  %v1475_v31 = vmul.f32 %v1398_v49, %v1398_v49  ;;  %v1523_v2 = vmul.f32 %v1445_v3, %v1445_v3  ;;  %v1527_v0 = vmul.f32 %v1448_v7, %v1448_v7 }
  0x57   : > { %v272_v52 = vadd.f32 %v271_v38, %v1338_v30  ;;  %v1479_v38 = vmul.f32 %v1401_v50, %v1401_v50  ;;  %v1489_v24 = vld [vmem:[%s1256_s5 + $0x110] sm:$0xff]  ;;  %v1497_v30 = vmul.f32 %v1420_v56, %v1420_v56  ;;  %2190 = vst [vmem:[#allocation31_spill] sm:$0xff] %v1501_v21  ;;  %2191 = vst [vmem:[#allocation32_spill] sm:$0xff] %v1505_v17  ;;  %v1508_v12 = vld [vmem:[%s1256_s5 + $0x120] sm:$0xff] }
  0x58   : > { %v309_v59 = vadd.f32 %v308_v45, %v1354_v35  ;;  %2186 = vst [vmem:[#allocation27_spill] sm:$0xff] %v1475_v31  ;;  %v1483_v45 = vmul.f32 %v1404_v51, %v1404_v51  ;;  %v1511_v8 = vld [vmem:[%s1256_s5 + $0x128] sm:$0xff]  ;;  %v1514_v5 = vld [vmem:[%s1256_s5 + $0x130] sm:$0xff]  ;;  %2193 = vst [vmem:[#allocation34_spill] sm:$0xff] %v1523_v2  ;;  %v1543_v2 = vmul.f32 %v1470_v22, %v1470_v22 }
  0x59   : > { %v273_v9 = vadd.f32 %v272_v52, %v1357_v36  ;;  %2187 = vst [vmem:[#allocation28_spill] sm:$0xff] %v1479_v38  ;;  %v1486_v52 = vld [vmem:[%s1256_s5 + $0x108] sm:$0xff]  ;;  %v1492_v36 = vld [vmem:[%s1256_s5 + $0x118] sm:$0xff]  ;;  %2189 = vst [vmem:[#allocation30_spill] sm:$0xff] %v1497_v30 }
  0x5a   : > { %v310_v26 = vadd.f32 %v309_v59, %v1360_v37  ;;  %2188 = vst [vmem:[#allocation29_spill] sm:$0xff] %v1483_v45  ;;  %2194 = vst [vmem:[#allocation35_spill] sm:$0xff] %v1527_v0  ;;  %v1530_v17 = vld [vmem:[%s1256_s5 + $0x138] sm:$0xff]  ;;  %v1546_v30 = vld [vmem:[%s1256_s5 + $0x140] sm:$0xff]  ;;  %v1571_v45 = vmul.f32 %v1511_v8, %v1511_v8 }
  0x5b   : > { %v274_v59 = vadd.f32 %v273_v9, %v1376_v42  ;;  %v1519_v42 = vmul.f32 %v1442_v63, %v1442_v63  ;;  %2197 = vst [vmem:[#allocation38_spill] sm:$0xff] %v1543_v2  ;;  %v1580_v38 = vld [vmem:[%s1256_s5 + $0x150] sm:$0xff] }
  0x5c   : > { %v311_v9 = vadd.f32 %v310_v26, %v1379_v43  ;;  %v1535_v26 = vmul.f32 %v1464_v18, %v1464_v18  ;;  %2202 = vst [vmem:[#allocation43_spill] sm:$0xff] %v1571_v45  ;;  %v443_v45 = vadd.f32 %v1343_v32, %v1331_v28 }
  0x5d   : > { %2192 = vst [vmem:[#allocation33_spill] sm:$0xff] %v1519_v42  ;;  %v275_v21 = vadd.f32 %v274_v59, %v1382_v44  ;;  %v1539_v42 = vmul.f32 %v1467_v20, %v1467_v20  ;;  %v1551_v59 = vmul.f32 %v1486_v52, %v1486_v52  ;;  %v1555_v44 = vmul.f32 %v1489_v24, %v1489_v24 }
  0x5e   : > { %2195 = vst [vmem:[#allocation36_spill] sm:$0xff] %v1535_v26  ;;  %v312_v0 = vadd.f32 %v311_v9, %v1398_v49  ;;  %v1562_v26 = vld [vmem:[%s1256_s5 + $0x148] sm:$0xff]  ;;  %v1567_v9 = vmul.f32 %v1508_v12, %v1508_v12 }
  0x5f   : > { %2196 = vst [vmem:[#allocation37_spill] sm:$0xff] %v1539_v42  ;;  %2198 = vst [vmem:[#allocation39_spill] sm:$0xff] %v1551_v59  ;;  %v1559_v42 = vmul.f32 %v1492_v36, %v1492_v36  ;;  %v276_v2 = vadd.f32 %v275_v21, %v1401_v50  ;;  %v1575_v59 = vmul.f32 %v1514_v5, %v1514_v5 }
  0x60   : > { %2199 = vst [vmem:[#allocation40_spill] sm:$0xff] %v1555_v44  ;;  %2201 = vst [vmem:[#allocation42_spill] sm:$0xff] %v1567_v9  ;;  %v1577_v44 = vld [vmem:[#allocation5] sm:$0x3]  ;;  %v1585_v21 = vmul.f32 %v1530_v17, %v1530_v17  ;;  %v406_v50 = vadd.f32 %v1335_v29, %v1327_v27  ;;  %v1597_v9 = vld [vmem:[%s1256_s5 + $0x158] sm:$0xff]  ;;  %v1615_v16 = vmul.f32 %v1562_v26, %v1562_v26 }
  0x61   : > { %2200 = vst [vmem:[#allocation41_spill] sm:$0xff] %v1559_v42  ;;  %2203 = vst [vmem:[#allocation44_spill] sm:$0xff] %v1575_v59  ;;  %v313_v42 = vadd.f32 %v312_v0, %v1404_v51  ;;  %v1594_v59 = vld [vmem:[%s2136_s2] sm:$0x3]  ;;  %v277_v31 = vadd.f32 %v276_v2, %v1420_v56  ;;  %v1602_v0 = vmul.f32 %v1546_v30, %v1546_v30 }
  0x62   : > { %2204 = vst [vmem:[#allocation45_spill] sm:$0xff] %v1585_v21  ;;  %2205 = vst [vmem:[#allocation46_spill] sm:$0xff] %v1594_v59  ;;  %v2207_v21 = vsub.s32 1, %v1299_v14  ;;  %v407_v2 = vadd.f32 %v406_v50, %v1347_v33  ;;  %v444_v56 = vadd.f32 %v443_v45, %v1351_v34  ;;  %v1634_v33 = vmul.f32 %v1597_v9, %v1597_v9 }
  0x63   : > { %2206 = vst [vmem:[#allocation47_spill] sm:$0xff] %v1602_v0  ;;  %v314_v32 = vadd.f32 %v313_v42, %v1423_v57  ;;  %v278_v0 = vadd.f32 %v277_v31, %v1426_v58 }
  0x64   : > { %v1607_v27 = vrot.slane %v1577_v44, %v2207_v21  ;;  %v2208_v28 = vmov %v2207_v21  ;;  %v1622_v21 = vmul.f32 %v1580_v38, %v1580_v38  ;;  %v408_v34 = vadd.f32 %v407_v2, %v1365_v39 }
  0x65   : > { %v584_v29 = vrot.slane %v1594_v59, %v2208_v28  ;;  %v315_v28 = vadd.f32 %v314_v32, %v1442_v63  ;;  %v445_v50 = vadd.f32 %v444_v56, %v1369_v40  ;;  %v279_v31 = vadd.f32 %v278_v0, %v1445_v3 }
  0x66   : > { %v1626_v14 = vrot.slane %v1607_v27, %v1318_v23  ;;  %v409_v59 = vadd.f32 %v408_v34, %v1373_v41 }
  0x67   : > { %v1629_v42 = vrot.slane %v584_v29, %v1318_v23  ;;  %v316_v58 = vadd.f32 %v315_v28, %v1448_v7  ;;  %v446_v39 = vadd.f32 %v445_v50, %v1387_v46  ;;  %v280_v56 = vadd.f32 %v279_v31, %v1464_v18 }
  0x68   : > { %v598_v45 = vmul.f32 %v1626_v14, %v1270_v1  ;;  %v600_v29 = vmul.f32 %v1626_v14, %v1276_v4  ;;  %v602_v32 = vmul.f32 %v1626_v14, %v1282_v6  ;;  %v604_v40 = vmul.f32 %v1626_v14, %v1292_v10 }
  0x69   : > { %v317_v2 = vadd.f32 %v316_v58, %v1467_v20  ;;  %v410_v6 = vadd.f32 %v409_v59, %v1391_v47  ;;  %v447_v28 = vadd.f32 %v446_v39, %v1395_v48  ;;  %v281_v46 = vadd.f32 %v280_v56, %v1470_v22 }
  0x6a   : > { %v670_v1 = vadd.f32 %v1629_v42, %v598_v45  ;;  %v672_v0 = vadd.f32 %v1629_v42, %v600_v29  ;;  %v674_v4 = vadd.f32 %v1629_v42, %v602_v32  ;;  %v676_v41 = vadd.f32 %v1629_v42, %v604_v40 }
  0x6b   : > { %v606_v10 = vmul.f32 %v1626_v14, %v1302_v15  ;;  %v608_v47 = vmul.f32 %v1626_v14, %v1310_v19  ;;  %v610_v48 = vmul.f32 %v1626_v14, %v1322_v25  ;;  %v318_v58 = vadd.f32 %v317_v2, %v1486_v52 }
  0x6c   : > { %734 = vst [vmem:[%s1661_s4 + $0x8] sm:$0xff] %v670_v1  ;;  %736 = vst [vmem:[%s1661_s4 + $0x18] sm:$0xff] %v672_v0  ;;  %v411_v59 = vadd.f32 %v410_v6, %v1409_v53  ;;  %v448_v34 = vadd.f32 %v447_v28, %v1413_v54  ;;  %v612_v50 = vmul.f32 %v1626_v14, %v1354_v35 }
  0x6d   : > { %738 = vst [vmem:[%s1661_s4 + $0x28] sm:$0xff] %v674_v4  ;;  %740 = vst [vmem:[%s1661_s4 + $0x38] sm:$0xff] %v676_v41  ;;  %v282_v15 = vadd.f32 %v281_v46, %v1489_v24  ;;  %v678_v19 = vadd.f32 %v1629_v42, %v606_v10  ;;  %v680_v31 = vadd.f32 %v1629_v42, %v608_v47  ;;  %v1721_v41 = vld [vmem:[%s1256_s5 + $0x160] sm:$0xff] }
  0x6e   : > { %v682_v25 = vadd.f32 %v1629_v42, %v610_v48  ;;  %v319_v45 = vadd.f32 %v318_v58, %v1492_v36  ;;  %v412_v29 = vadd.f32 %v411_v59, %v1417_v55  ;;  %v449_v53 = vadd.f32 %v448_v34, %v1431_v60  ;;  %v2209_v46 = vld [vmem:[#allocation26_spill] sm:$0xff]  ;;  %v2210_v47 = vld [vmem:[#allocation27_spill] sm:$0xff] }
  0x6f   : > { %v684_v54 = vadd.f32 %v1629_v42, %v612_v50  ;;  %v283_v32 = vadd.f32 %v282_v15, %v1508_v12  ;;  %742 = vst [vmem:[%s1661_s4 + $0x48] sm:$0xff] %v678_v19  ;;  %744 = vst [vmem:[%s1661_s4 + $0x58] sm:$0xff] %v680_v31  ;;  %v614_v35 = vmul.f32 %v1626_v14, %v1360_v37  ;;  %v1737_v50 = vld [vmem:[%s1256_s5 + $0x170] sm:$0xff] }
  0x70   : > { %746 = vst [vmem:[%s1661_s4 + $0x68] sm:$0xff] %v682_v25  ;;  %v616_v39 = vmul.f32 %v1626_v14, %v1379_v43  ;;  %v618_v40 = vmul.f32 %v1626_v14, %v1398_v49  ;;  %v320_v55 = vadd.f32 %v319_v45, %v1511_v8  ;;  %v413_v60 = vadd.f32 %v412_v29, %v1435_v61  ;;  %v2211_v19 = vld [vmem:[#allocation28_spill] sm:$0xff]  ;;  %v2212_v25 = vld [vmem:[#allocation29_spill] sm:$0xff] }
  0x71   : > { %v450_v56 = vadd.f32 %v449_v53, %v1439_v62  ;;  %748 = vst [vmem:[%s1661_s4 + $0x78] sm:$0xff] %v684_v54  ;;  %v620_v1 = vmul.f32 %v1626_v14, %v1404_v51  ;;  %v284_v37 = vadd.f32 %v283_v32, %v1514_v5  ;;  %v686_v43 = vadd.f32 %v1629_v42, %v614_v35  ;;  %v1744_v29 = vld [vmem:[%s1256_s5 + $0x178] sm:$0xff] }
  0x72   : > { %v688_v0 = vadd.f32 %v1629_v42, %v616_v39  ;;  %v690_v49 = vadd.f32 %v1629_v42, %v618_v40  ;;  %v321_v4 = vadd.f32 %v320_v55, %v1530_v17  ;;  %v414_v61 = vadd.f32 %v413_v60, %v1453_v11  ;;  %v1757_v39 = vld [vmem:[%s1256_s5 + $0x180] sm:$0xff] }
  0x73   : > { %v451_v62 = vadd.f32 %v450_v56, %v1457_v13  ;;  %v692_v2 = vadd.f32 %v1629_v42, %v620_v1  ;;  %v285_v51 = vadd.f32 %v284_v37, %v1546_v30  ;;  %750 = vst [vmem:[%s1661_s4 + $0x88] sm:$0xff] %v686_v43  ;;  %v622_v6 = vmul.f32 %v1626_v14, %v1423_v57  ;;  %v2213_v55 = vld [vmem:[#allocation30_spill] sm:$0xff]  ;;  %v2214_v56 = vld [vmem:[#allocation31_spill] sm:$0xff] }
  0x74   : > { %752 = vst [vmem:[%s1661_s4 + $0x98] sm:$0xff] %v688_v0  ;;  %754 = vst [vmem:[%s1661_s4 + $0xa8] sm:$0xff] %v690_v49  ;;  %v624_v28 = vmul.f32 %v1626_v14, %v1442_v63  ;;  %v626_v11 = vmul.f32 %v1626_v14, %v1448_v7  ;;  %v322_v13 = vadd.f32 %v321_v4, %v1562_v26  ;;  %v1730_v63 = vld [vmem:[%s1256_s5 + $0x168] sm:$0xff]  ;;  %v1773_v49 = vld [vmem:[%s1256_s5 + $0x190] sm:$0xff] }
  0x75   : > { %v415_v10 = vadd.f32 %v414_v61, %v2209_v46  ;;  %v452_v48 = vadd.f32 %v451_v62, %v2210_v47  ;;  %756 = vst [vmem:[%s1661_s4 + $0xb8] sm:$0xff] %v692_v2  ;;  %v628_v57 = vmul.f32 %v1626_v14, %v1467_v20  ;;  %v286_v7 = vadd.f32 %v285_v51, %v1580_v38  ;;  %v2215_v61 = vld [vmem:[#allocation32_spill] sm:$0xff]  ;;  %v2216_v2 = vld [vmem:[#allocation33_spill] sm:$0xff] }
  0x76   : > { %v694_v58 = vadd.f32 %v1629_v42, %v622_v6  ;;  %v696_v59 = vadd.f32 %v1629_v42, %v624_v28  ;;  %v698_v34 = vadd.f32 %v1629_v42, %v626_v11  ;;  %v323_v15 = vadd.f32 %v322_v13, %v1597_v9  ;;  %v1780_v6 = vld [vmem:[%s1256_s5 + $0x198] sm:$0xff] }
  0x77   : > { %v416_v31 = vadd.f32 %v415_v10, %v2211_v19  ;;  %v453_v20 = vadd.f32 %v452_v48, %v2212_v25  ;;  %v700_v45 = vadd.f32 %v1629_v42, %v628_v57  ;;  %v287_v53 = vadd.f32 %v286_v7, %v1721_v41  ;;  %v1793_v10 = vld [vmem:[%s1256_s5 + $0x1a0] sm:$0xff] }
  0x78   : > { %758 = vst [vmem:[%s1661_s4 + $0xc8] sm:$0xff] %v694_v58  ;;  %760 = vst [vmem:[%s1661_s4 + $0xd8] sm:$0xff] %v696_v59  ;;  %v630_v54 = vmul.f32 %v1626_v14, %v1486_v52  ;;  %v632_v32 = vmul.f32 %v1626_v14, %v1492_v36  ;;  %v634_v35 = vmul.f32 %v1626_v14, %v1511_v8  ;;  %v1766_v36 = vld [vmem:[%s1256_s5 + $0x188] sm:$0xff]  ;;  %v2217_v48 = vld [vmem:[#allocation34_spill] sm:$0xff] }
  0x79   : > { %762 = vst [vmem:[%s1661_s4 + $0xe8] sm:$0xff] %v698_v34  ;;  %v324_v40 = vadd.f32 %v323_v15, %v1730_v63  ;;  %v417_v60 = vadd.f32 %v416_v31, %v2213_v55  ;;  %v454_v1 = vadd.f32 %v453_v20, %v2214_v56  ;;  %764 = vst [vmem:[%s1661_s4 + $0xf8] sm:$0xff] %v700_v45  ;;  %v2218_v7 = vld [vmem:[#allocation35_spill] sm:$0xff]  ;;  %v1809_v31 = vld [vmem:[%s1256_s5 + $0x1b0] sm:$0xff] }
  0x7a   : > { %v636_v52 = vmul.f32 %v1626_v14, %v1530_v17  ;;  %v288_v8 = vadd.f32 %v287_v53, %v1737_v50  ;;  %v702_v37 = vadd.f32 %v1629_v42, %v630_v54  ;;  %v704_v43 = vadd.f32 %v1629_v42, %v632_v32  ;;  %v2219_v20 = vld [vmem:[#allocation36_spill] sm:$0xff]  ;;  %v2220_v53 = vld [vmem:[#allocation37_spill] sm:$0xff] }
  0x7b   : > { %v706_v0 = vadd.f32 %v1629_v42, %v634_v35  ;;  %v325_v4 = vadd.f32 %v324_v40, %v1744_v29  ;;  %v418_v62 = vadd.f32 %v417_v60, %v2215_v61  ;;  %v455_v17 = vadd.f32 %v454_v1, %v2216_v2  ;;  %v1816_v35 = vld [vmem:[%s1256_s5 + $0x1b8] sm:$0xff]  ;;  %v1829_v1 = vld [vmem:[%s1256_s5 + $0x1c0] sm:$0xff]  ;;  %v1838_v61 = vld [vmem:[%s1256_s5 + $0x1c8] sm:$0xff] }
  0x7c   : > { %v708_v51 = vadd.f32 %v1629_v42, %v636_v52  ;;  %v289_v28 = vadd.f32 %v288_v8, %v1757_v39  ;;  %766 = vst [vmem:[%s1661_s4 + $0x108] sm:$0xff] %v702_v37  ;;  %768 = vst [vmem:[%s1661_s4 + $0x118] sm:$0xff] %v704_v43  ;;  %v638_v11 = vmul.f32 %v1626_v14, %v1562_v26  ;;  %v2221_v8 = vld [vmem:[#allocation38_spill] sm:$0xff]  ;;  %v2222_v43 = vld [vmem:[#allocation39_spill] sm:$0xff] }
  0x7d   : > { %770 = vst [vmem:[%s1661_s4 + $0x128] sm:$0xff] %v706_v0  ;;  %v640_v13 = vmul.f32 %v1626_v14, %v1597_v9  ;;  %v642_v46 = vmul.f32 %v1626_v14, %v1730_v63  ;;  %v326_v47 = vadd.f32 %v325_v4, %v1766_v36  ;;  %v419_v57 = vadd.f32 %v418_v62, %v2217_v48  ;;  %v1802_v9 = vld [vmem:[%s1256_s5 + $0x1a8] sm:$0xff] }
  0x7e   : > { %v456_v58 = vadd.f32 %v455_v17, %v2218_v7  ;;  %772 = vst [vmem:[%s1661_s4 + $0x138] sm:$0xff] %v708_v51  ;;  %v644_v26 = vmul.f32 %v1626_v14, %v1744_v29  ;;  %v290_v59 = vadd.f32 %v289_v28, %v1773_v49  ;;  %v710_v34 = vadd.f32 %v1629_v42, %v638_v11  ;;  %v1845_v28 = vld [vmem:[%s1256_s5 + $0x1d0] sm:$0xff]  ;;  %v1848_v11 = vld [vmem:[%s1256_s5 + $0x1d8] sm:$0xff] }
  0x7f   : > { %v712_v15 = vadd.f32 %v1629_v42, %v640_v13  ;;  %v714_v19 = vadd.f32 %v1629_v42, %v642_v46  ;;  %v327_v25 = vadd.f32 %v326_v47, %v1780_v6  ;;  %v420_v45 = vadd.f32 %v419_v57, %v2219_v20  ;;  %v1851_v13 = vld [vmem:[%s1256_s5 + $0x1e8] sm:$0xff]  ;;  %v2224_v57 = vld [vmem:[#allocation41_spill] sm:$0xff] }
  0x80   : > { %v457_v54 = vadd.f32 %v456_v58, %v2220_v53  ;;  %v716_v32 = vadd.f32 %v1629_v42, %v644_v26  ;;  %v291_v40 = vadd.f32 %v290_v59, %v1793_v10  ;;  %774 = vst [vmem:[%s1661_s4 + $0x148] sm:$0xff] %v710_v34  ;;  %v646_v55 = vmul.f32 %v1626_v14, %v1766_v36  ;;  %v2223_v47 = vld [vmem:[#allocation40_spill] sm:$0xff]  ;;  %v1858_v26 = vld [vmem:[%s1256_s5 + $0x1f8] sm:$0xff] }
  0x81   : > { %776 = vst [vmem:[%s1661_s4 + $0x158] sm:$0xff] %v712_v15  ;;  %778 = vst [vmem:[%s1661_s4 + $0x168] sm:$0xff] %v714_v19  ;;  %v648_v60 = vmul.f32 %v1626_v14, %v1780_v6  ;;  %v650_v56 = vmul.f32 %v1626_v14, %v1802_v9  ;;  %v328_v52 = vadd.f32 %v327_v25, %v1802_v9  ;;  %v1871_v25 = vld [vmem:[%s1256_s5 + $0x1e0] sm:$0xff] }
  0x82   : > { %v421_v37 = vadd.f32 %v420_v45, %v2221_v8  ;;  %v458_v0 = vadd.f32 %v457_v54, %v2222_v43  ;;  %780 = vst [vmem:[%s1661_s4 + $0x178] sm:$0xff] %v716_v32  ;;  %v652_v4 = vmul.f32 %v1626_v14, %v1816_v35  ;;  %v292_v62 = vadd.f32 %v291_v40, %v1809_v31  ;;  %v2225_v45 = vld [vmem:[#allocation42_spill] sm:$0xff]  ;;  %v2226_v54 = vld [vmem:[#allocation43_spill] sm:$0xff] }
  0x83   : > { %v718_v2 = vadd.f32 %v1629_v42, %v646_v55  ;;  %v720_v17 = vadd.f32 %v1629_v42, %v648_v60  ;;  %v722_v51 = vadd.f32 %v1629_v42, %v650_v56  ;;  %v329_v46 = vadd.f32 %v328_v52, %v1816_v35 }
  0x84   : > { %v422_v48 = vadd.f32 %v421_v37, %v2223_v47  ;;  %v459_v7 = vadd.f32 %v458_v0, %v2224_v57  ;;  %v724_v58 = vadd.f32 %v1629_v42, %v652_v4  ;;  %v293_v59 = vadd.f32 %v292_v62, %v1829_v1  ;;  %v2227_v37 = vld [vmem:[#allocation44_spill] sm:$0xff]  ;;  %v2228_v0 = vld [vmem:[#allocation45_spill] sm:$0xff]  ;;  %v2229_v47 = vld [vmem:[#allocation47_spill] sm:$0xff] }
  0x85   : > { %782 = vst [vmem:[%s1661_s4 + $0x188] sm:$0xff] %v718_v2  ;;  %784 = vst [vmem:[%s1661_s4 + $0x198] sm:$0xff] %v720_v17  ;;  %v654_v34 = vmul.f32 %v1626_v14, %v1838_v61  ;;  %v656_v15 = vmul.f32 %v1626_v14, %v1848_v11  ;;  %v658_v19 = vmul.f32 %v1626_v14, %v1851_v13  ;;  %v1888_v2 = vld [vmem:[%s1256_s5 + $0x1f0] sm:$0xff] }
  0x86   : > { %786 = vst [vmem:[%s1661_s4 + $0x1a8] sm:$0xff] %v722_v51  ;;  %v330_v20 = vadd.f32 %v329_v46, %v1838_v61  ;;  %v423_v53 = vadd.f32 %v422_v48, %v2225_v45  ;;  %v460_v32 = vadd.f32 %v459_v7, %v2226_v54  ;;  %788 = vst [vmem:[%s1661_s4 + $0x1b8] sm:$0xff] %v724_v58 }
  0x87   : > { %v660_v40 = vmul.f32 %v1626_v14, %v1858_v26  ;;  %v294_v55 = vadd.f32 %v293_v59, %v1845_v28  ;;  %v726_v60 = vadd.f32 %v1629_v42, %v654_v34  ;;  %v728_v56 = vadd.f32 %v1629_v42, %v656_v15 }
  0x88   : > { %v730_v52 = vadd.f32 %v1629_v42, %v658_v19  ;;  %v331_v8 = vadd.f32 %v330_v20, %v1848_v11  ;;  %v424_v43 = vadd.f32 %v423_v53, %v2227_v37  ;;  %v461_v4 = vadd.f32 %v460_v32, %v2228_v0 }
  0x89   : > { %v732_v62 = vadd.f32 %v1629_v42, %v660_v40  ;;  %v295_v14 = vadd.f32 %v294_v55, %v1871_v25  ;;  %v386_v17 = vmul.f32 %v1721_v41, %v1721_v41  ;;  %790 = vst [vmem:[%s1661_s4 + $0x1c8] sm:$0xff] %v726_v60  ;;  %792 = vst [vmem:[%s1661_s4 + $0x1d8] sm:$0xff] %v728_v56 }
  0x8a   : > { %794 = vst [vmem:[%s1661_s4 + $0x1e8] sm:$0xff] %v730_v52  ;;  %v332_v51 = vadd.f32 %v331_v8, %v1851_v13  ;;  %v387_v46 = vmul.f32 %v1730_v63, %v1730_v63  ;;  %v425_v48 = vadd.f32 %v424_v43, %v2229_v47  ;;  %v462_v57 = vadd.f32 %v461_v4, %v1615_v16 }
  0x8b   : > { %796 = vst [vmem:[%s1661_s4 + $0x1f8] sm:$0xff] %v732_v62  ;;  %v388_v42 = vmul.f32 %v1737_v50, %v1737_v50  ;;  %v389_v7 = vmul.f32 %v1744_v29, %v1744_v29  ;;  %v296_v58 = vadd.f32 %v295_v14, %v1888_v2  ;;  %v390_v63 = vmul.f32 %v1757_v39, %v1757_v39 }
  0x8c   : > { %v333_v59 = vadd.f32 %v332_v51, %v1858_v26  ;;  %v426_v34 = vadd.f32 %v425_v48, %v1622_v21  ;;  %v463_v15 = vadd.f32 %v462_v57, %v1634_v33  ;;  %v391_v16 = vmul.f32 %v1766_v36, %v1766_v36 }
  0x8d   : > { %v392_v45 = vmul.f32 %v1773_v49, %v1773_v49  ;;  %v393_v29 = vmul.f32 %v1780_v6, %v1780_v6  ;;  %v297_v53 = vrot.slane %v296_v58, 4  ;;  %v394_v33 = vmul.f32 %v1793_v10, %v1793_v10 }
  0x8e   : > { %v427_v19 = vadd.f32 %v426_v34, %v386_v17  ;;  %v464_v20 = vadd.f32 %v463_v15, %v387_v46  ;;  %v334_v54 = vrot.slane %v333_v59, 4  ;;  %v395_v40 = vmul.f32 %v1802_v9, %v1802_v9 }
  0x8f   : > { %v396_v60 = vmul.f32 %v1809_v31, %v1809_v31  ;;  %v397_v56 = vmul.f32 %v1816_v35, %v1816_v35  ;;  %v298_v52 = vadd.f32 %v297_v53, %v296_v58  ;;  %v398_v43 = vmul.f32 %v1829_v1, %v1829_v1 }
  0x90   : > { %v428_v32 = vadd.f32 %v427_v19, %v388_v42  ;;  %v465_v21 = vadd.f32 %v464_v20, %v389_v7  ;;  %v335_v6 = vadd.f32 %v334_v54, %v333_v59  ;;  %v399_v0 = vmul.f32 %v1838_v61, %v1838_v61 }
  0x91   : > { %v400_v62 = vmul.f32 %v1845_v28, %v1845_v28  ;;  %v401_v14 = vmul.f32 %v1848_v11, %v1848_v11  ;;  %v299_v17 = vrot.slane %v298_v52, 2  ;;  %v402_v47 = vmul.f32 %v1871_v25, %v1871_v25 }
  0x92   : > { %v429_v55 = vadd.f32 %v428_v32, %v390_v63  ;;  %v466_v36 = vadd.f32 %v465_v21, %v391_v16  ;;  %v336_v35 = vrot.slane %v335_v6, 2  ;;  %v403_v48 = vmul.f32 %v1851_v13, %v1851_v13 }
  0x93   : > { %v404_v42 = vmul.f32 %v1888_v2, %v1888_v2  ;;  %v405_v7 = vmul.f32 %v1858_v26, %v1858_v26  ;;  %v300_v58 = vadd.f32 %v299_v17, %v298_v52 }
  0x94   : > { %v430_v8 = vadd.f32 %v429_v55, %v392_v45  ;;  %v467_v37 = vadd.f32 %v466_v36, %v393_v29  ;;  %v337_v11 = vadd.f32 %v336_v35, %v335_v6 }
  0x95   : > { %v301_v16 = vrot.slane %v300_v58, 1 }
  0x96   : > { %v431_v4 = vadd.f32 %v430_v8, %v394_v33  ;;  %v468_v9 = vadd.f32 %v467_v37, %v395_v40  ;;  %v338_v19 = vrot.slane %v337_v11, 1 }
  0x97   : > { %v302_v53 = vadd.f32 %v301_v16, %v300_v58  ;;  %v2230_v58 = vld [vmem:[#allocation16_spill] sm:$0xff] }
  0x98   : > { %v432_v51 = vadd.f32 %v431_v4, %v396_v60  ;;  %v469_v46 = vadd.f32 %v468_v9, %v397_v56  ;;  %v339_v54 = vadd.f32 %v338_v19, %v337_v11 }
  0x99   : > { %v340_v55 = vmul.f32 0.00390625, %v302_v53 }
  0x9a   : > { %v433_v57 = vadd.f32 %v432_v51, %v398_v43  ;;  %v470_v61 = vadd.f32 %v469_v46, %v399_v0  ;;  %v341_v26 = vmul.f32 0.00390625, %v339_v54  ;;  %v1106_v46 = vmov 1966171168   ;;  %v2231_v54 = vld [vmem:[#allocation46_spill] sm:$0xff] }
  0x9b   : > { %v482_v37 = vmul.f32 %v340_v55, %v340_v55 }
  0x9c   : > { %v434_v59 = vadd.f32 %v433_v57, %v400_v62  ;;  %v471_v34 = vadd.f32 %v470_v61, %v401_v14  ;;  %v483_v43 = vmul.f32 %v341_v26, %v341_v26 }
  0x9e   : > { %v435_v15 = vadd.f32 %v434_v59, %v402_v47  ;;  %v472_v63 = vadd.f32 %v471_v34, %v403_v48  ;;  %v503_v47 = vunpack.c.l.s4 %v1106_v46  ;;  %v533_v48 = vrot.slane %v1577_v44, %v1318_v23 }
  0xa0   : > { %v436_v20 = vadd.f32 %v435_v15, %v404_v42  ;;  %v473_v45 = vadd.f32 %v472_v63, %v405_v7  ;;  %v504_v57 = vunpack.c.0.s8 %v503_v47  ;;  %v542_v61 = vmul.f32 %v533_v48, %v340_v55 }
  0xa1   : > { %v543_v42 = vmul.f32 %v1607_v27, %v341_v26  ;;  %v2233_v26 = vld [vmem:[#allocation12_spill] sm:$0xff] }
  0xa2   : > { %v437_v29 = vrot.slane %v436_v20, 4  ;;  %v474_v13 = vrot.slane %v473_v45, 4  ;;  %v507_v11 = vsub.s32 %v504_v57, %v2230_v58  ;;  %v2240_v57 = vld [vmem:[#allocation20_spill] sm:$0xff]  ;;  %v2242_v58 = vld [vmem:[#allocation22_spill] sm:$0xff] }
  0xa4   : > { %v438_v32 = vadd.f32 %v437_v29, %v436_v20  ;;  %v475_v21 = vadd.f32 %v474_v13, %v473_v45 }
  0xa6   : > { %v439_v33 = vrot.slane %v438_v32, 2  ;;  %v476_v40 = vrot.slane %v475_v21, 2 }
  0xa8   : > { %v440_v36 = vadd.f32 %v439_v33, %v438_v32  ;;  %v477_v60 = vadd.f32 %v476_v40, %v475_v21  ;;  %v2232_v33 = vld [vmem:[#allocation11_spill] sm:$0xff] }
  0xaa   : > { %v441_v56 = vrot.slane %v440_v36, 1  ;;  %v478_v52 = vrot.slane %v477_v60, 1 }
  0xac   : > { %v442_v6 = vadd.f32 %v441_v56, %v440_v36  ;;  %v479_v8 = vadd.f32 %v478_v52, %v477_v60  ;;  %v2234_v36 = vld [vmem:[#allocation13_spill] sm:$0xff]  ;;  %v2235_v56 = vld [vmem:[#allocation14_spill] sm:$0xff] }
  0xae   : > { %v480_v0 = vmul.f32 0.00390625, %v442_v6  ;;  %v481_v4 = vmul.f32 0.00390625, %v479_v8  ;;  %v2236_v6 = vld [vmem:[#allocation15_spill] sm:$0xff] }
  0xb0   : > { %v484_v9 = vsub.f32 %v480_v0, %v482_v37  ;;  %v485_v62 = vsub.f32 %v481_v4, %v483_v43  ;;  %v2237_v37 = vld [vmem:[#allocation17_spill] sm:$0xff]  ;;  %v2238_v0 = vld [vmem:[#allocation18_spill] sm:$0xff] }
  0xb2   : > { %v486_v14 = vmax.f32 %v484_v9, 0.0  ;;  %v487_v17 = vmax.f32 %v485_v62, 0.0 }
  0xb4   : > { %v488_v35 = vadd.f32 1e-05, %v486_v14  ;;  %v489_v51 = vadd.f32 1e-05, %v487_v17  ;;  %v2239_v14 = vld [vmem:[#allocation19_spill] sm:$0xff] }
  0xb6   : > { %974 = vrsqrt.f32 %v488_v35 }
  0xb7   : > { %976 = vrsqrt.f32 %v489_v51 }
  0xc3   : > { %v975_v7 = vpop.eup %974 }
  0xc4   : > { %v977_v59 = vpop.eup %976  ;;  %v544_v34 = vmul.f32 %v975_v7, %v542_v61 }
  0xc5   : > { %v501_v15 = vcombine.low %v975_v7, %v977_v59  ;;  %v545_v63 = vmul.f32 %v977_v59, %v543_v42  ;;  %v2241_v42 = vld [vmem:[#allocation21_spill] sm:$0xff]  ;;  %v2243_v59 = vld [vmem:[#allocation23_spill] sm:$0xff] }
  0xc7   : > { %v508_v16 = vrot.slane %v501_v15, %v507_v11  ;;  %v548_v19 = vcombine.low %v544_v34, %v545_v63  ;;  %v2244_v15 = vld [vmem:[#allocation24_spill] sm:$0xff] }
  0xc9   : > { %v515_v20 = vrot.slane %v508_v16, %v507_v11  ;;  %v555_v45 = vrot.slane %v548_v19, %v507_v11  ;;  %v2245_v16 = vld [vmem:[#allocation25_spill] sm:$0xff] }
  0xcb   : > { %v517_v29 = vmul.f32 %v515_v20, %v1577_v44  ;;  %v562_v13 = vrot.slane %v555_v45, %v507_v11 }
  0xcd   : > { %v522_v53 = vrot.slane %v517_v29, %v1318_v23  ;;  %v564_v32 = vsub.f32 %v2231_v54, %v562_v13 }
  0xcf   : > { %v569_v27 = vrot.slane %v564_v32, %v1318_v23  ;;  %v1951_v21 = vrot.slane %v522_v53, %v1318_v23 }
  0xd1   : > { %v597_v40 = vmul.f32 %v1951_v21, %v2232_v33  ;;  %v1956_v55 = vrot.slane %v569_v27, %v1318_v23  ;;  %v599_v44 = vmul.f32 %v1951_v21, %v2233_v26  ;;  %v601_v60 = vmul.f32 %v1951_v21, %v2234_v36 }
  0xd2   : > { %v603_v52 = vmul.f32 %v1951_v21, %v2235_v56  ;;  %v605_v8 = vmul.f32 %v1951_v21, %v2236_v6  ;;  %v607_v43 = vmul.f32 %v1951_v21, %v2237_v37  ;;  %v609_v23 = vmul.f32 %v1951_v21, %v2238_v0 }
  0xd3   : > { %v669_v4 = vadd.f32 %v1956_v55, %v597_v40  ;;  %v671_v9 = vadd.f32 %v1956_v55, %v599_v44  ;;  %v673_v62 = vadd.f32 %v1956_v55, %v601_v60  ;;  %v611_v17 = vmul.f32 %v1951_v21, %v2239_v14 }
  0xd4   : > { %v675_v35 = vadd.f32 %v1956_v55, %v603_v52  ;;  %v677_v51 = vadd.f32 %v1956_v55, %v605_v8  ;;  %v679_v46 = vadd.f32 %v1956_v55, %v607_v43  ;;  %v681_v47 = vadd.f32 %v1956_v55, %v609_v23 }
  0xd5   : > { %733 = vst [vmem:[%s1661_s4] sm:$0xff] %v669_v4  ;;  %735 = vst [vmem:[%s1661_s4 + $0x10] sm:$0xff] %v671_v9  ;;  %v683_v48 = vadd.f32 %v1956_v55, %v611_v17  ;;  %v613_v61 = vmul.f32 %v1951_v21, %v2240_v57  ;;  %v615_v7 = vmul.f32 %v1951_v21, %v2241_v42 }
  0xd6   : > { %737 = vst [vmem:[%s1661_s4 + $0x20] sm:$0xff] %v673_v62  ;;  %v617_v11 = vmul.f32 %v1951_v21, %v2242_v58  ;;  %739 = vst [vmem:[%s1661_s4 + $0x30] sm:$0xff] %v675_v35  ;;  %v619_v34 = vmul.f32 %v1951_v21, %v2243_v59  ;;  %v621_v63 = vmul.f32 %v1951_v21, %v2244_v15 }
  0xd7   : > { %741 = vst [vmem:[%s1661_s4 + $0x40] sm:$0xff] %v677_v51  ;;  %743 = vst [vmem:[%s1661_s4 + $0x50] sm:$0xff] %v679_v46  ;;  %v623_v19 = vmul.f32 %v1951_v21, %v2245_v16  ;;  %v625_v20 = vmul.f32 %v1951_v21, %v1445_v3  ;;  %v685_v45 = vadd.f32 %v1956_v55, %v613_v61 }
  0xd8   : > { %745 = vst [vmem:[%s1661_s4 + $0x60] sm:$0xff] %v681_v47  ;;  %747 = vst [vmem:[%s1661_s4 + $0x70] sm:$0xff] %v683_v48  ;;  %v687_v29 = vadd.f32 %v1956_v55, %v615_v7  ;;  %v689_v13 = vadd.f32 %v1956_v55, %v617_v11  ;;  %v627_v53 = vmul.f32 %v1951_v21, %v1464_v18 }
  0xd9   : > { %v691_v54 = vadd.f32 %v1956_v55, %v619_v34  ;;  %v693_v32 = vadd.f32 %v1956_v55, %v621_v63  ;;  %v695_v3 = vadd.f32 %v1956_v55, %v623_v19  ;;  %v697_v27 = vadd.f32 %v1956_v55, %v625_v20  ;;  %749 = vst [vmem:[%s1661_s4 + $0x80] sm:$0xff] %v685_v45 }
  0xda   : > { %751 = vst [vmem:[%s1661_s4 + $0x90] sm:$0xff] %v687_v29  ;;  %753 = vst [vmem:[%s1661_s4 + $0xa0] sm:$0xff] %v689_v13  ;;  %v699_v33 = vadd.f32 %v1956_v55, %v627_v53  ;;  %v629_v40 = vmul.f32 %v1951_v21, %v1470_v22  ;;  %v631_v18 = vmul.f32 %v1951_v21, %v1489_v24 }
  0xdb   : > { %v633_v26 = vmul.f32 %v1951_v21, %v1508_v12  ;;  %755 = vst [vmem:[%s1661_s4 + $0xb0] sm:$0xff] %v691_v54  ;;  %757 = vst [vmem:[%s1661_s4 + $0xc0] sm:$0xff] %v693_v32  ;;  %v635_v44 = vmul.f32 %v1951_v21, %v1514_v5  ;;  %v637_v36 = vmul.f32 %v1951_v21, %v1546_v30 }
  0xdc   : > { %759 = vst [vmem:[%s1661_s4 + $0xd0] sm:$0xff] %v695_v3  ;;  %761 = vst [vmem:[%s1661_s4 + $0xe0] sm:$0xff] %v697_v27  ;;  %v639_v22 = vmul.f32 %v1951_v21, %v1580_v38  ;;  %v641_v24 = vmul.f32 %v1951_v21, %v1721_v41  ;;  %v701_v12 = vadd.f32 %v1956_v55, %v629_v40 }
  0xdd   : > { %763 = vst [vmem:[%s1661_s4 + $0xf0] sm:$0xff] %v699_v33  ;;  %v703_v60 = vadd.f32 %v1956_v55, %v631_v18  ;;  %v705_v56 = vadd.f32 %v1956_v55, %v633_v26  ;;  %v643_v5 = vmul.f32 %v1951_v21, %v1737_v50  ;;  %v707_v30 = vadd.f32 %v1956_v55, %v635_v44 }
  0xde   : > { %v709_v38 = vadd.f32 %v1956_v55, %v637_v36  ;;  %v711_v41 = vadd.f32 %v1956_v55, %v639_v22  ;;  %v713_v52 = vadd.f32 %v1956_v55, %v641_v24  ;;  %765 = vst [vmem:[%s1661_s4 + $0x100] sm:$0xff] %v701_v12  ;;  %v645_v8 = vmul.f32 %v1951_v21, %v1757_v39 }
  0xdf   : > { %767 = vst [vmem:[%s1661_s4 + $0x110] sm:$0xff] %v703_v60  ;;  %769 = vst [vmem:[%s1661_s4 + $0x120] sm:$0xff] %v705_v56  ;;  %v715_v6 = vadd.f32 %v1956_v55, %v643_v5  ;;  %v647_v50 = vmul.f32 %v1951_v21, %v1773_v49  ;;  %v649_v37 = vmul.f32 %v1951_v21, %v1793_v10 }
  0xe0   : > { %771 = vst [vmem:[%s1661_s4 + $0x130] sm:$0xff] %v707_v30  ;;  %773 = vst [vmem:[%s1661_s4 + $0x140] sm:$0xff] %v709_v38  ;;  %v651_v43 = vmul.f32 %v1951_v21, %v1809_v31  ;;  %v653_v39 = vmul.f32 %v1951_v21, %v1829_v1  ;;  %v655_v49 = vmul.f32 %v1951_v21, %v1845_v28 }
  0xe1   : > { %775 = vst [vmem:[%s1661_s4 + $0x150] sm:$0xff] %v711_v41  ;;  %777 = vst [vmem:[%s1661_s4 + $0x160] sm:$0xff] %v713_v52  ;;  %v657_v10 = vmul.f32 %v1951_v21, %v1871_v25  ;;  %v717_v0 = vadd.f32 %v1956_v55, %v645_v8  ;;  %v719_v23 = vadd.f32 %v1956_v55, %v647_v50 }
  0xe2   : > { %779 = vst [vmem:[%s1661_s4 + $0x170] sm:$0xff] %v715_v6  ;;  %v721_v31 = vadd.f32 %v1956_v55, %v649_v37  ;;  %v659_v1 = vmul.f32 %v1951_v21, %v1888_v2  ;;  %v723_v28 = vadd.f32 %v1956_v55, %v651_v43  ;;  %v725_v25 = vadd.f32 %v1956_v55, %v653_v39 }
  0xe3   : > { %v727_v4 = vadd.f32 %v1956_v55, %v655_v49  ;;  %v729_v9 = vadd.f32 %v1956_v55, %v657_v10  ;;  %781 = vst [vmem:[%s1661_s4 + $0x180] sm:$0xff] %v717_v0  ;;  %783 = vst [vmem:[%s1661_s4 + $0x190] sm:$0xff] %v719_v23 }
  0xe4   : > { %785 = vst [vmem:[%s1661_s4 + $0x1a0] sm:$0xff] %v721_v31  ;;  %v731_v2 = vadd.f32 %v1956_v55, %v659_v1  ;;  %787 = vst [vmem:[%s1661_s4 + $0x1b0] sm:$0xff] %v723_v28 }
  0xe5   : > { %789 = vst [vmem:[%s1661_s4 + $0x1c0] sm:$0xff] %v725_v25  ;;  %791 = vst [vmem:[%s1661_s4 + $0x1d0] sm:$0xff] %v727_v4 }
  0xe6   : > { %793 = vst [vmem:[%s1661_s4 + $0x1e0] sm:$0xff] %v729_v9  ;;  %795 = vst [vmem:[%s1661_s4 + $0x1f0] sm:$0xff] %v731_v2 }
  0xe7   : > { %1045 = shalt.err (!%p1042_p0)
}
  0xe8   : > { %s1046_s17 = scalar_lea.hbm %s2080_s6, 8192  ;;  %s1050_s29 = scalar_lea.hbm %s2137_s3, 16384 }
  0xe9   : > { %p1047_p4 = scmp.ne.s32.totalorder %s2080_s6, %s1046_s17  ;;  %p1051_p6 = scmp.lt.s32.totalorder %s2080_s6, %s2137_s3 }
  0xea   : > { %p1052_p13 = scmp.lt.s32.totalorder %s1050_s29, %s1046_s17 }
  0xeb   : > { %p1048_p11 = pnand %p1047_p4, %p2246_p1 }
  0xec   : > { %p1053_p3 = por %p1052_p13, %p1051_p6 }
  0xed   : > { %p1049_p5 = pneg %p1048_p11 }
  0xef   : > { %p1054_p12 = pnand %p1053_p3, %p1049_p5 }
  0xf1   : > { %1057 = shalt.err (!%p1054_p12)
}
  0xf2   : > { %s1108_s26 = smov 256   ;;  %s1109_s4 = smov 16  }
  0xf3   : > { %918 = dma.vmem_to_hbm [thread:$0]  (%p2246_p1), %s2082_s20, 8192, %s2080_s6, %s798_s7, %s1108_s26, %s1108_s26, %s1109_s4  }
  0xf4 PF: > { %s826_s11 = sand.u32 1, %s1088_s12   ;;  %p2247_p7 = scmp.ne.s32.totalorder %s2161_s25, 0 }
  0xf5   : > { %p2248_p8 = scmp.ge.s32.totalorder %s1100_s15, 2  ;;  %s827_s16 = scalar_lea.sflag [#allocation4], %s826_s11 }
  0xf7   : > { %p929_p9 = pnand %p2248_p8, %p2247_p7 }
  0xf9   : > { %p930_p10 = pneg %p929_p9 }
  0xfb   : > { %1083 = dma.done.wait (%p930_p10), %s827_s16, 8192  }
  0xfc   : > { %1085 = vsyncadd (%p930_p10), %s827_s16, 4294959104  ;;  %p17_p2 = scmp.ge.s32.totalorder %s1155_s18, 4   ;;  %s2249_s12 = smov %s1092_s13 }
  0xfd   : > { %s2250_s13 = smov %s1096_s14  ;;  %s2251_s14 = smov %s1167_s21 }
  0xfe   : > { %s2252_s15 = smov %s1155_s18  ;;  %19 = sbr.rel (!%p17_p2) target bundleno = 6 (0x6), region = 81 }
 0x103   :  { %832 = vsyncpa [#allocation3], 1 }
 0x104   :  { %834 = vsyncpa [#allocation3 + $0x1], 1 }
 0x105   :  { %835 = vsyncpa [#allocation6], 1 }
 0x106   :  { %836 = vsyncpa [#allocation4], 1 }
 0x107   :  { %838 = vsyncpa [#allocation4 + $0x1], 1 }

</bundles_post_ra>
